<compile_context>
chip_gen: v5e
topology: v5e:2x2
jax: 0.10.0
libtpu: 0.0.40
codegen_flags: <defaults>
</compile_context>

<pallas_src>
import jax
import jax.numpy as jnp
from jax.experimental import pallas as pl
from jax.experimental.pallas import tpu as pltpu


_SUBLANES = 8
_COLS = 512                              # lane width: large multiple of 128
_TARGET_BLOCK_BYTES = 2 * 1024 * 1024    # ~2 MiB per input block


def _mse_partial_kernel(x_ref, t_ref, o_ref):
    """Accumulate partial sums of (x - t)^2 into a lane-dense resident block.

    x_ref / t_ref : (rt, 8, COLS) input tiles.
    o_ref         : (1, 8, COLS) f32 partial-sum block (same block across the
                    reduction axis -> acts as the accumulator).
    """
    k = pl.program_id(1)

    @pl.when(k == 0)
    def _init():
        o_ref[...] = jnp.zeros_like(o_ref)

    diff = x_ref[...].astype(jnp.float32) - t_ref[...].astype(jnp.float32)
    # Reduce only the leading (block-row) axis: pure VPU vadds, no per-step
    # cross-lane XLU work and no SMEM scalar read-modify-write chain.
    o_ref[...] += jnp.sum(diff * diff, axis=0, keepdims=True)


def mse_loss_pallas(x, t):
    """Pallas implementation of MSELoss(input, target) = sum((x-t)^2) / B."""
    assert x.shape == t.shape, (x.shape, t.shape)
    batch = x.shape[0]
    n = x.size

    group_elems = _SUBLANES * _COLS                   # elements per (8, COLS) group
    num_groups = pl.cdiv(n, group_elems)

    # Block sizing by bytes so bf16 inputs get wider blocks than f32.
    itemsize = max(x.dtype.itemsize, t.dtype.itemsize)
    max_rt = max(1, _TARGET_BLOCK_BYTES // (group_elems * itemsize))

    # Split the reduction across TensorCores (v7x megacore) when there is
    # enough work; on single-TC chips the parallel axis just runs serially.
    num_parallel = 2 if num_groups >= 16 else 1
    groups_per_core = pl.cdiv(num_groups, num_parallel)
    rt = int(min(max_rt, groups_per_core))            # groups per block
    steps = pl.cdiv(groups_per_core, rt)              # reduction steps per core

    padded_groups = num_parallel * steps * rt
    padded_elems = padded_groups * group_elems

    def to_slab(a):
        flat = a.reshape(-1)
        pad = padded_elems - n
        if pad:
            flat = jnp.pad(flat, (0, pad))            # zeros add 0 to the sum
        return flat.reshape(padded_groups, _SUBLANES, _COLS)

    x_slab = to_slab(x)
    t_slab = to_slab(t)

    in_index = lambda p, k: (p * steps + k, 0, 0)

    partials = pl.pallas_call(
        _mse_partial_kernel,
        out_shape=jax.ShapeDtypeStruct(
            (num_parallel, _SUBLANES, _COLS), jnp.float32),
        grid_spec=pltpu.PrefetchScalarGridSpec(
            num_scalar_prefetch=0,
            grid=(num_parallel, steps),
            in_specs=[
                pl.BlockSpec((rt, _SUBLANES, _COLS), in_index),
                pl.BlockSpec((rt, _SUBLANES, _COLS), in_index),
            ],
            out_specs=pl.BlockSpec((1, _SUBLANES, _COLS),
                                   lambda p, k: (p, 0, 0)),
        ),
        compiler_params=pltpu.CompilerParams(
            dimension_semantics=("parallel", "arbitrary"),
        ),
        cost_estimate=pl.CostEstimate(
            flops=3 * padded_elems,
            transcendentals=0,
            bytes_accessed=int(x.nbytes + t.nbytes),
        ),
    )(x_slab, t_slab)

    # Tiny epilogue: one cross-lane reduce over (P, 8, COLS) partials in XLA,
    # then divide by the TRUE batch size (padding contributed nothing).
    return jnp.sum(partials) / jnp.float32(batch)


class FlowLoss:
    """JAX/Pallas port of the PyTorch FlowLoss module (forward pass only)."""

    def __init__(self, **kwargs):
        self.loss_type = kwargs.get("type", "motionnormalizedloss3d")
        if self.loss_type == "mse":
            self.loss_func = mse_loss_pallas
        elif self.loss_type == "motionnormalizedloss3d":
            # TODO(synk): MotionNormalizedLoss3D not provided in reference source.
            raise NotImplementedError(
                "motionnormalizedloss3d has no reference implementation")
        else:
            raise ValueError(f"unknown loss type {self.loss_type}")

    def __call__(self, input, target, wts=None):
        if self.loss_type == "mse":
            return self.loss_func(input, target)
        raise NotImplementedError


def _mse_ref(x, t):
    b = x.shape[0]
    d = (x.astype(jnp.float32) - t.astype(jnp.float32)).reshape(b, -1)
    return jnp.mean(jnp.sum(d * d, axis=1))


if __name__ == "__main__":
    key = jax.random.PRNGKey(0)
    k1, k2 = jax.random.split(key)

    B, C, H, W = 2, 4, 16, 16  # D = C*H*W = 1024
    x = jax.random.normal(k1, (B, C, H, W), dtype=jnp.float32)
    t = jax.random.normal(k2, (B, C, H, W), dtype=jnp.float32)

    loss_mod = FlowLoss(type="mse")
    loss = loss_mod(x, t)
    loss = jax.block_until_ready(loss)

    ref = _mse_ref(x, t)
    assert jnp.allclose(loss, ref, rtol=1e-5, atol=1e-5), (loss, ref)

    print("KERNEL_OK")
</pallas_src>

<mosaic_0001>
module attributes {stable_mosaic.version = 11 : i64} {
  func.func @_mse_partial_kernel(%arg0: i32, %arg1: i32, %arg2: memref<1x8x512xf32, #tpu.memory_space<vmem>>, %arg3: memref<1x8x512xf32, #tpu.memory_space<vmem>>, %arg4: memref<1x8x512xf32, #tpu.memory_space<vmem>>) attributes {dimension_semantics = [#tpu.dimension_semantics<parallel>, #tpu.dimension_semantics<arbitrary>], iteration_bounds = array<i64: 1, 1>, scalar_prefetch = 0 : i64, scratch_operands = 0 : i64, tpu.core_type = #tpu.core_type<tc>, window_params = [{transform_indices = @transform_0, window_bounds = array<i64: 1, 8, 512>}, {transform_indices = @transform_1, window_bounds = array<i64: 1, 8, 512>}, {transform_indices = @transform_2, window_bounds = array<i64: 1, 8, 512>}]} {
    %c0_i32 = arith.constant 0 : i32
    %0 = arith.cmpi eq, %arg1, %c0_i32 : i32
    %1 = arith.extui %0 : i1 to i32
    %c0_i32_0 = arith.constant 0 : i32
    %2 = arith.cmpi ne, %1, %c0_i32_0 : i32
    scf.if %2 {
      %cst_12 = arith.constant 0.000000e+00 : f32
      %12 = vector.broadcast %cst_12 : f32 to vector<1x8x512xf32>
      %c0_13 = arith.constant 0 : index
      %c0_14 = arith.constant 0 : index
      %c0_15 = arith.constant 0 : index
      %13 = vector.load %arg4[%c0_13, %c0_14, %c0_15] : memref<1x8x512xf32, #tpu.memory_space<vmem>>, vector<1x8x512xf32>
      tpu.vector_store %arg4[%c0_13, %c0_14, %c0_15], %12 {strides = array<i32>} : memref<1x8x512xf32, #tpu.memory_space<vmem>>, vector<1x8x512xf32>,
    } else {
    }
    %c0 = arith.constant 0 : index
    %c0_1 = arith.constant 0 : index
    %c0_2 = arith.constant 0 : index
    %3 = vector.load %arg2[%c0, %c0_1, %c0_2] : memref<1x8x512xf32, #tpu.memory_space<vmem>>, vector<1x8x512xf32>
    %c0_3 = arith.constant 0 : index
    %c0_4 = arith.constant 0 : index
    %c0_5 = arith.constant 0 : index
    %4 = vector.load %arg3[%c0_3, %c0_4, %c0_5] : memref<1x8x512xf32, #tpu.memory_space<vmem>>, vector<1x8x512xf32>
    %5 = arith.subf %3, %4 : vector<1x8x512xf32>
    %c0_6 = arith.constant 0 : index
    %c0_7 = arith.constant 0 : index
    %c0_8 = arith.constant 0 : index
    %6 = vector.load %arg4[%c0_6, %c0_7, %c0_8] : memref<1x8x512xf32, #tpu.memory_space<vmem>>, vector<1x8x512xf32>
    %7 = arith.mulf %5, %5 : vector<1x8x512xf32>
    %cst = arith.constant dense<0.000000e+00> : vector<8x512xf32>
    %8 = vector.multi_reduction <add>, %7, %cst [0] : vector<1x8x512xf32> to vector<8x512xf32>
    %9 = vector.shape_cast %8 : vector<8x512xf32> to vector<1x8x512xf32>
    %10 = arith.addf %6, %9 : vector<1x8x512xf32>
    %c0_9 = arith.constant 0 : index
    %c0_10 = arith.constant 0 : index
    %c0_11 = arith.constant 0 : index
    %11 = vector.load %arg4[%c0_9, %c0_10, %c0_11] : memref<1x8x512xf32, #tpu.memory_space<vmem>>, vector<1x8x512xf32>
    tpu.vector_store %arg4[%c0_9, %c0_10, %c0_11], %10 {strides = array<i32>} : memref<1x8x512xf32, #tpu.memory_space<vmem>>, vector<1x8x512xf32>,
    return
  }
  func.func @transform_0(%arg0: i32, %arg1: i32) -> (i32, i32, i32) {
    %c1_i32 = arith.constant 1 : i32
    %0 = arith.muli %arg0, %c1_i32 : i32
    %1 = arith.addi %0, %arg1 : i32
    %c0_i32 = arith.constant 0 : i32
    %c0_i32_0 = arith.constant 0 : i32
    %c0_i32_1 = arith.constant 0 : i32
    return %1, %c0_i32, %c0_i32_0 : i32, i32, i32
  }
  func.func @transform_1(%arg0: i32, %arg1: i32) -> (i32, i32, i32) {
    %c1_i32 = arith.constant 1 : i32
    %0 = arith.muli %arg0, %c1_i32 : i32
    %1 = arith.addi %0, %arg1 : i32
    %c0_i32 = arith.constant 0 : i32
    %c0_i32_0 = arith.constant 0 : i32
    %c0_i32_1 = arith.constant 0 : i32
    return %1, %c0_i32, %c0_i32_0 : i32, i32, i32
  }
  func.func @transform_2(%arg0: i32, %arg1: i32) -> (i32, i32, i32) {
    %c0_i32 = arith.constant 0 : i32
    %c0_i32_0 = arith.constant 0 : i32
    %c0_i32_1 = arith.constant 0 : i32
    return %arg0, %c0_i32, %c0_i32_0 : i32, i32, i32
  }
}

</mosaic_0001>

<bundles_post_ra>
// kernel: tpu_custom_call.1
= control target key start
LH: loop header
LB: loop body
LE: loop exit
PB: predicated region body
PF: predicated region fallthrough
CT: control target
= control target key end

     0   :  { %7 = vsyncpa [#allocation3], 0  ;;  %s217_s0 = inlined_call_operand.hbm [shape: f32[1,8,512], index: 0, kind: input, shape index: {}]   ;;  %s218_s1 = inlined_call_operand.hbm [shape: f32[1,8,512], index: 1, kind: input, shape index: {}]   ;;  %s219_s2 = inlined_call_operand.hbm [shape: f32[1,8,512], index: 2, kind: output, shape index: {}]  }
   0x1   :  { %8 = vsyncpa [#allocation6], 0 }
   0x2   :  { %9 = vsyncpa [#allocation4], 0  ;;  %s19_s11 = sshll.u32 %s217_s0, 4  ;;  %s190_s12 = smov [#allocation2]   ;;  %s20_s11 = int_to_ptr.hbm [resolvable:$true] %s19_s11 }
   0x3   :  { %s21_s13 = sshll.u32 %s190_s12, 4  ;;  %s34_s16 = sshll.u32 %s218_s1, 4  ;;  %s22_s13 = int_to_ptr.vmem [resolvable:$true] %s21_s13  ;;  %s35_s16 = int_to_ptr.hbm [resolvable:$true] %s34_s16 }
   0x4   :  { %24 = dma.hbm_to_vmem [thread:$0]  %s20_s11, 512, %s22_s13, [#allocation3]  }
   0x5   :  { %s191_s17 = smov [#allocation5]  }
   0x6   :  { %s36_s18 = sshll.u32 %s191_s17, 4  ;;  %s37_s18 = int_to_ptr.vmem [resolvable:$true] %s36_s18 }
   0x7   :  { %39 = dma.hbm_to_vmem [thread:$0]  %s35_s16, 512, %s37_s18, [#allocation6]  }
   0x8   :  { %184 = dma.done.wait [#allocation3], 512  }
   0x9   :  { %185 = vsyncadd [#allocation3], 4294966784 }
   0xa   :  { %186 = dma.done.wait [#allocation6], 512  }
   0xb   :  { %187 = vsyncadd [#allocation6], 4294966784  ;;  %v58_v0 = vld [vmem:[#allocation2] sm:$0xff]  ;;  %v59_v2 = vld [vmem:[#allocation2 + $0x8] sm:$0xff]  ;;  %s192_s0 = smov [#allocation7]   ;;  %s97_s21 = sshll.u32 %s219_s2, 4  ;;  %s98_s21 = int_to_ptr.hbm [resolvable:$true] %s97_s21 }
   0xc   :  { %v62_v1 = vld [vmem:[#allocation5] sm:$0xff]  ;;  %v63_v4 = vld [vmem:[#allocation5 + $0x8] sm:$0xff]  ;;  %v60_v5 = vld [vmem:[#allocation2 + $0x10] sm:$0xff]  ;;  %s95_s1 = sshll.u32 %s192_s0, 4  ;;  %s96_s1 = int_to_ptr.vmem [resolvable:$true] %s95_s1 }
   0xd   :  { %v66_v3 = vsub.f32 %v58_v0, %v62_v1  ;;  %v64_v6 = vld [vmem:[#allocation5 + $0x10] sm:$0xff]  ;;  %v67_v7 = vsub.f32 %v59_v2, %v63_v4  ;;  %v61_v9 = vld [vmem:[#allocation2 + $0x18] sm:$0xff] }
   0xe   :  { %v68_v8 = vsub.f32 %v60_v5, %v64_v6  ;;  %v65_v10 = vld [vmem:[#allocation5 + $0x18] sm:$0xff] }
   0xf   :  { %v74_v11 = vmul.f32 %v66_v3, %v66_v3  ;;  %v69_v12 = vsub.f32 %v61_v9, %v65_v10  ;;  %v75_v13 = vmul.f32 %v67_v7, %v67_v7 }
  0x10   :  { %v76_v14 = vmul.f32 %v68_v8, %v68_v8 }
  0x11   :  { %v77_v15 = vmul.f32 %v69_v12, %v69_v12  ;;  %86 = vst [vmem:[#allocation7] sm:$0xff] %v74_v11 }
  0x12   :  { %87 = vst [vmem:[#allocation7 + $0x8] sm:$0xff] %v75_v13 }
  0x13   :  { %88 = vst [vmem:[#allocation7 + $0x10] sm:$0xff] %v76_v14 }
  0x14   :  { %89 = vst [vmem:[#allocation7 + $0x18] sm:$0xff] %v77_v15 }
  0x15   :  { %100 = dma.vmem_to_hbm [thread:$0]  %s96_s1, 512, %s98_s21, [#allocation4]  }
  0x16   :  { %188 = dma.done.wait [#allocation4], 512  }
  0x17   :  { %189 = vsyncadd [#allocation4], 4294966784 }
  0x18   :  { %105 = vsyncpa [#allocation3], 1 }
  0x19   :  { %106 = vsyncpa [#allocation6], 1 }
  0x1a   :  { %107 = vsyncpa [#allocation4], 1 }

</bundles_post_ra>
